<compile_context>
chip_gen: v7x
topology: tpu7x:2x2x1
jax: 0.10.0
libtpu: 0.0.40
codegen_flags: <defaults>
</compile_context>

<pallas_src>
import functools

import jax
import jax.numpy as jnp
from jax.experimental import pallas as pl
from jax.experimental.pallas import tpu as pltpu

EPS = 1e-9


def _adawin_kernel(x_ref, hm_ref, o_ref, *, window_length):
    W = window_length
    p = W // 2

    x = x_ref[...].astype(jnp.float32)    # (Bb, C, T), cast in VMEM
    hm = hm_ref[...]                      # (Bb, 3, T) f32: [gamma_raw, beta_raw, mask]
    Bb, C, T = x.shape
    mask = hm[:, 2, :]                    # (Bb, T), 1 inside the sequence

    def wsum(a):
        # Zero-padded windowed sum along the last (lane) axis: AvgPool kernel W,
        # stride 1, padding W//2, divisor_override=1.  O(W) shifted adds on row
        # vectors; same summation order as the PyTorch/JAX reference.
        lead = a.shape[:-1]
        zl = jnp.zeros(lead + (p,), a.dtype)
        zr = jnp.zeros(lead + (W - 1 - p,), a.dtype)
        ap = jnp.concatenate([zl, a, zr], axis=-1)       # (..., T + W - 1)
        total = ap[..., 0:T]
        for k in range(1, W):
            total = total + ap[..., k:k + T]
        return total

    # --- windowed sums of per-time row quantities --------------------------
    pooled_hm = wsum(hm)                  # one call for [h0, h1, mask]
    p_g = pooled_hm[:, 0, :]
    p_b = pooled_hm[:, 1, :]
    p_mask = pooled_hm[:, 2, :]           # windowed count of valid positions

    x_csum = jnp.sum(x, axis=1)           # (Bb, T) sum over channels
    p_x = wsum(x_csum)

    inv_cnt = 1.0 / (p_mask + EPS)                  # SumPool1d.mean denominator
    inv_den = 1.0 / (float(C) * p_mask + EPS)       # SumChannelsPool1d denominator

    gamma = p_g * inv_cnt * mask          # (Bb, T)
    beta = p_b * inv_cnt * mask           # (Bb, T)
    mean = p_x * inv_den * mask           # (Bb, T) layer-windowed mean

    # Two-pass variance (kept instead of E[x^2]-mean^2: no cancellation risk).
    xm = x - mean[:, None, :]                         # (Bb, C, T)
    term_csum = jnp.sum(xm * xm, axis=1) * mask       # (Bb, T)
    var = wsum(term_csum) * inv_den * mask            # (Bb, T)

    # Fused tail: (1 + gamma) * (x - mean) * rsqrt(var + eps) + beta.
    # NOTE: positions t >= length give x * rsqrt(eps), exactly like the
    # PyTorch module (unmasked garbage by design).
    a_row = (1.0 + gamma) * jax.lax.rsqrt(var + EPS)  # (Bb, T)
    out = a_row[:, None, :] * xm + beta[:, None, :]
    o_ref[...] = out.astype(o_ref.dtype)


def _pick_block_b(B, C, T, itemsize):
    # ~2 MiB of x per block already reaches ~85% of the HBM roofline; keeping
    # the block modest leaves room for double-buffered I/O + f32 temporaries on
    # v7x's 64 MiB VMEM, and keeps >= 2 (ideally 4+) grid steps so the
    # "parallel" batch axis can be sharded across v7x's two TensorCores.
    target_x_bytes = 2 * 1024 * 1024
    auto = max(1, target_x_bytes // max(1, C * T * itemsize))
    cap = max(1, -(-B // 4))
    auto = int(min(auto, cap, B))
    # Largest divisor of B that is <= auto: avoids any batch-padding HBM copy.
    for d in range(auto, 0, -1):
        if B % d == 0:
            return d
    return 1


def adawin_layer1d(x, s, lengths, w_eff, bias, window_length, *, block_b=None):
    """x: (B, C, T), s: (B, style, T), lengths: (B,) int.  Returns (B, C, T) in x.dtype."""
    # TODO(synk): lengths=None path (AvgPool1d mean, count_include_pad=False) is not implemented.
    B, C, T = x.shape

    # fc(s): tiny (2 x style) projection -> XLA (its MXU tile would be >95% idle rows in-kernel).
    h = jnp.einsum('os,bst->bot', w_eff.astype(jnp.float32), s.astype(jnp.float32))
    h = h + bias.astype(jnp.float32).reshape(1, 2, 1)                    # (B, 2, T)
    mask = (jnp.arange(T, dtype=jnp.int32)[None, :]
            < lengths.astype(jnp.int32)[:, None]).astype(jnp.float32)    # (B, T)
    hm = jnp.concatenate([h, mask[:, None, :]], axis=1)                  # (B, 3, T)

    if block_b is None:
        block_b = _pick_block_b(B, C, T, x.dtype.itemsize)
    # TODO(synk): very large C*T still needs time-axis tiling with a W//2 halo
    # (a single batch element's f32 temporaries must fit v7x's 64 MiB VMEM).

    kernel = functools.partial(_adawin_kernel, window_length=window_length)

    itemsize = x.dtype.itemsize
    cost = pl.CostEstimate(
        flops=int(B * T * (8 * C + 10 * window_length)),
        transcendentals=int(B * T),
        bytes_accessed=int(2 * B * C * T * itemsize + 2 * hm.size * 4),
    )

    return pl.pallas_call(
        kernel,
        out_shape=jax.ShapeDtypeStruct((B, C, T), x.dtype),
        grid=(B // block_b,),
        in_specs=[
            pl.BlockSpec((block_b, C, T), lambda i: (i, 0, 0)),   # x (native dtype)
            pl.BlockSpec((block_b, 3, T), lambda i: (i, 0, 0)),   # [h0, h1, mask] f32
        ],
        out_specs=pl.BlockSpec((block_b, C, T), lambda i: (i, 0, 0)),
        compiler_params=pltpu.CompilerParams(
            dimension_semantics=("parallel",),
            vmem_limit_bytes=32 * 1024 * 1024,
        ),
        cost_estimate=cost,
    )(x, hm)


def adawin_reference(x, s, lengths, w_eff, bias, W):
    """Pure-JAX reference reproducing the PyTorch forward semantics."""
    B, C, T = x.shape
    p = W // 2

    def wsum(a):  # zero-padded windowed sum along last axis (divisor_override=1)
        pad = [(0, 0)] * (a.ndim - 1) + [(p, W - 1 - p)]
        ap = jnp.pad(a, pad)
        return sum(ap[..., k:k + T] for k in range(W))

    mask1 = (jnp.arange(T)[None, :] < lengths[:, None]).astype(x.dtype)[:, None, :]
    h = jnp.einsum('os,bst->bot', w_eff, s) + bias[None, :, None]     # (B, 2, T)

    pooled_mask = wsum(mask1)
    gamma = wsum(h[:, :1]) / (pooled_mask + EPS) * mask1
    beta = wsum(h[:, 1:]) / (pooled_mask + EPS) * mask1

    maskC = jnp.broadcast_to(mask1, (B, C, T))
    num_mean = jnp.sum(wsum(x), axis=1, keepdims=True)
    denom = jnp.sum(wsum(maskC), axis=1, keepdims=True)
    mean = num_mean / (denom + EPS) * maskC
    term = jnp.square(x - mean) * maskC
    var = jnp.sum(wsum(term), axis=1, keepdims=True) / (denom + EPS) * maskC
    x_norm = (x - mean) / jnp.sqrt(var + EPS)
    return (1.0 + gamma) * x_norm + beta


if __name__ == "__main__":
    STYLE_DIM = 6
    WINDOW = 5
    root = jax.random.PRNGKey(0)

    cases = [
        # (B, C, T, lengths): C a multiple of 8, lane-aligned T (production-like)
        (2, 8, 128, (128, 77)),
        # ragged T (not a multiple of 128), small C, B prime -> block_b = 1, grid = (3,)
        (3, 4, 48, (48, 31, 17)),
    ]
    for idx, (B, C, T, lens) in enumerate(cases):
        kx, ks, kv, kg, kb = jax.random.split(jax.random.fold_in(root, idx), 5)
        x = jax.random.normal(kx, (B, C, T), dtype=jnp.float32)
        s = jax.random.normal(ks, (B, STYLE_DIM, T), dtype=jnp.float32)
        lengths = jnp.array(lens, dtype=jnp.int32)

        # weight_norm(nn.Linear(style_dim, 2)): effective W = g * v / ||v||_row
        v = jax.random.normal(kv, (2, STYLE_DIM), dtype=jnp.float32) * 0.3
        g = jax.random.normal(kg, (2,), dtype=jnp.float32) * 0.1 + 1.0
        bias = jax.random.normal(kb, (2,), dtype=jnp.float32) * 0.1
        w_eff = g[:, None] * v / jnp.linalg.norm(v, axis=1, keepdims=True)

        out = adawin_layer1d(x, s, lengths, w_eff, bias, WINDOW)
        jax.block_until_ready(out)

        ref = adawin_reference(x, s, lengths, w_eff, bias, WINDOW)
        assert out.shape == (B, C, T) and out.dtype == x.dtype
        max_err = float(jnp.max(jnp.abs(out - ref)))
        assert jnp.allclose(out, ref, rtol=1e-4, atol=1e-4), max_err

    print("KERNEL_OK")
</pallas_src>

<mosaic_0001>
module attributes {stable_mosaic.version = 11 : i64} {
  func.func @_adawin_kernel(%arg0: i32, %arg1: memref<1x8x128xf32, #tpu.memory_space<vmem>>, %arg2: memref<1x3x128xf32, #tpu.memory_space<vmem>>, %arg3: memref<1x8x128xf32, #tpu.memory_space<vmem>>) attributes {dimension_semantics = [#tpu.dimension_semantics<parallel>], iteration_bounds = array<i64: 2>, scalar_prefetch = 0 : i64, scratch_operands = 0 : i64, tpu.core_type = #tpu.core_type<tc>, window_params = [{transform_indices = @transform_0, window_bounds = array<i64: 1, 8, 128>}, {transform_indices = @transform_1, window_bounds = array<i64: 1, 3, 128>}, {transform_indices = @transform_2, window_bounds = array<i64: 1, 8, 128>}]} {
    %c0 = arith.constant 0 : index
    %c0_0 = arith.constant 0 : index
    %c0_1 = arith.constant 0 : index
    %0 = vector.load %arg1[%c0, %c0_0, %c0_1] : memref<1x8x128xf32, #tpu.memory_space<vmem>>, vector<1x8x128xf32>
    %c0_2 = arith.constant 0 : index
    %c0_3 = arith.constant 0 : index
    %c0_4 = arith.constant 0 : index
    %1 = vector.load %arg2[%c0_2, %c0_3, %c0_4] : memref<1x3x128xf32, #tpu.memory_space<vmem>>, vector<1x3x128xf32>
    %2 = vector.extract_strided_slice %1 {offsets = [0, 2, 0], sizes = [1, 1, 128], strides = [1, 1, 1]} : vector<1x3x128xf32> to vector<1x1x128xf32>
    %3 = vector.shape_cast %2 : vector<1x1x128xf32> to vector<1x128xf32>
    %cst = arith.constant 0.000000e+00 : f32
    %4 = vector.broadcast %cst : f32 to vector<1x3x2xf32>
    %cst_5 = arith.constant 0.000000e+00 : f32
    %5 = vector.broadcast %cst_5 : f32 to vector<1x3x2xf32>
    %6 = tpu.concatenate %4, %1, %5 in 2 : vector<1x3x2xf32>, vector<1x3x128xf32>, vector<1x3x2xf32> -> vector<1x3x132xf32>
    %7 = vector.extract_strided_slice %6 {offsets = [0, 0, 0], sizes = [1, 3, 128], strides = [1, 1, 1]} : vector<1x3x132xf32> to vector<1x3x128xf32>
    %8 = vector.extract_strided_slice %6 {offsets = [0, 0, 1], sizes = [1, 3, 128], strides = [1, 1, 1]} : vector<1x3x132xf32> to vector<1x3x128xf32>
    %9 = arith.addf %7, %8 : vector<1x3x128xf32>
    %10 = vector.extract_strided_slice %6 {offsets = [0, 0, 2], sizes = [1, 3, 128], strides = [1, 1, 1]} : vector<1x3x132xf32> to vector<1x3x128xf32>
    %11 = arith.addf %9, %10 : vector<1x3x128xf32>
    %12 = vector.extract_strided_slice %6 {offsets = [0, 0, 3], sizes = [1, 3, 128], strides = [1, 1, 1]} : vector<1x3x132xf32> to vector<1x3x128xf32>
    %13 = arith.addf %11, %12 : vector<1x3x128xf32>
    %14 = vector.extract_strided_slice %6 {offsets = [0, 0, 4], sizes = [1, 3, 128], strides = [1, 1, 1]} : vector<1x3x132xf32> to vector<1x3x128xf32>
    %15 = arith.addf %13, %14 : vector<1x3x128xf32>
    %16 = vector.extract_strided_slice %15 {offsets = [0, 0, 0], sizes = [1, 1, 128], strides = [1, 1, 1]} : vector<1x3x128xf32> to vector<1x1x128xf32>
    %17 = vector.shape_cast %16 : vector<1x1x128xf32> to vector<1x128xf32>
    %18 = vector.extract_strided_slice %15 {offsets = [0, 1, 0], sizes = [1, 1, 128], strides = [1, 1, 1]} : vector<1x3x128xf32> to vector<1x1x128xf32>
    %19 = vector.shape_cast %18 : vector<1x1x128xf32> to vector<1x128xf32>
    %20 = vector.extract_strided_slice %15 {offsets = [0, 2, 0], sizes = [1, 1, 128], strides = [1, 1, 1]} : vector<1x3x128xf32> to vector<1x1x128xf32>
    %21 = vector.shape_cast %20 : vector<1x1x128xf32> to vector<1x128xf32>
    %cst_6 = arith.constant dense<0.000000e+00> : vector<1x128xf32>
    %22 = vector.multi_reduction <add>, %0, %cst_6 [1] : vector<1x8x128xf32> to vector<1x128xf32>
    %cst_7 = arith.constant 0.000000e+00 : f32
    %23 = vector.broadcast %cst_7 : f32 to vector<1x2xf32>
    %cst_8 = arith.constant 0.000000e+00 : f32
    %24 = vector.broadcast %cst_8 : f32 to vector<1x2xf32>
    %25 = tpu.concatenate %23, %22, %24 in 1 : vector<1x2xf32>, vector<1x128xf32>, vector<1x2xf32> -> vector<1x132xf32>
    %26 = vector.extract_strided_slice %25 {offsets = [0, 0], sizes = [1, 128], strides = [1, 1]} : vector<1x132xf32> to vector<1x128xf32>
    %27 = vector.extract_strided_slice %25 {offsets = [0, 1], sizes = [1, 128], strides = [1, 1]} : vector<1x132xf32> to vector<1x128xf32>
    %28 = arith.addf %26, %27 : vector<1x128xf32>
    %29 = vector.extract_strided_slice %25 {offsets = [0, 2], sizes = [1, 128], strides = [1, 1]} : vector<1x132xf32> to vector<1x128xf32>
    %30 = arith.addf %28, %29 : vector<1x128xf32>
    %31 = vector.extract_strided_slice %25 {offsets = [0, 3], sizes = [1, 128], strides = [1, 1]} : vector<1x132xf32> to vector<1x128xf32>
    %32 = arith.addf %30, %31 : vector<1x128xf32>
    %33 = vector.extract_strided_slice %25 {offsets = [0, 4], sizes = [1, 128], strides = [1, 1]} : vector<1x132xf32> to vector<1x128xf32>
    %34 = arith.addf %32, %33 : vector<1x128xf32>
    %cst_9 = arith.constant 9.99999971E-10 : f32
    %35 = vector.broadcast %cst_9 : f32 to vector<1x128xf32>
    %36 = arith.addf %21, %35 : vector<1x128xf32>
    %cst_10 = arith.constant 1.000000e+00 : f32
    %37 = vector.broadcast %cst_10 : f32 to vector<1x128xf32>
    %38 = arith.divf %37, %36 : vector<1x128xf32>
    %cst_11 = arith.constant 8.000000e+00 : f32
    %39 = vector.broadcast %cst_11 : f32 to vector<1x128xf32>
    %40 = arith.mulf %39, %21 : vector<1x128xf32>
    %cst_12 = arith.constant 9.99999971E-10 : f32
    %41 = vector.broadcast %cst_12 : f32 to vector<1x128xf32>
    %42 = arith.addf %40, %41 : vector<1x128xf32>
    %cst_13 = arith.constant 1.000000e+00 : f32
    %43 = vector.broadcast %cst_13 : f32 to vector<1x128xf32>
    %44 = arith.divf %43, %42 : vector<1x128xf32>
    %45 = arith.mulf %17, %38 : vector<1x128xf32>
    %46 = arith.mulf %45, %3 : vector<1x128xf32>
    %47 = arith.mulf %19, %38 : vector<1x128xf32>
    %48 = arith.mulf %47, %3 : vector<1x128xf32>
    %49 = arith.mulf %34, %44 : vector<1x128xf32>
    %50 = arith.mulf %49, %3 : vector<1x128xf32>
    %51 = vector.shape_cast %50 : vector<1x128xf32> to vector<1x1x128xf32>
    %52 = vector.broadcast %51 : vector<1x1x128xf32> to vector<1x8x128xf32>
    %53 = arith.subf %0, %52 : vector<1x8x128xf32>
    %54 = arith.mulf %53, %53 : vector<1x8x128xf32>
    %cst_14 = arith.constant dense<0.000000e+00> : vector<1x128xf32>
    %55 = vector.multi_reduction <add>, %54, %cst_14 [1] : vector<1x8x128xf32> to vector<1x128xf32>
    %56 = arith.mulf %55, %3 : vector<1x128xf32>
    %cst_15 = arith.constant 0.000000e+00 : f32
    %57 = vector.broadcast %cst_15 : f32 to vector<1x2xf32>
    %cst_16 = arith.constant 0.000000e+00 : f32
    %58 = vector.broadcast %cst_16 : f32 to vector<1x2xf32>
    %59 = tpu.concatenate %57, %56, %58 in 1 : vector<1x2xf32>, vector<1x128xf32>, vector<1x2xf32> -> vector<1x132xf32>
    %60 = vector.extract_strided_slice %59 {offsets = [0, 0], sizes = [1, 128], strides = [1, 1]} : vector<1x132xf32> to vector<1x128xf32>
    %61 = vector.extract_strided_slice %59 {offsets = [0, 1], sizes = [1, 128], strides = [1, 1]} : vector<1x132xf32> to vector<1x128xf32>
    %62 = arith.addf %60, %61 : vector<1x128xf32>
    %63 = vector.extract_strided_slice %59 {offsets = [0, 2], sizes = [1, 128], strides = [1, 1]} : vector<1x132xf32> to vector<1x128xf32>
    %64 = arith.addf %62, %63 : vector<1x128xf32>
    %65 = vector.extract_strided_slice %59 {offsets = [0, 3], sizes = [1, 128], strides = [1, 1]} : vector<1x132xf32> to vector<1x128xf32>
    %66 = arith.addf %64, %65 : vector<1x128xf32>
    %67 = vector.extract_strided_slice %59 {offsets = [0, 4], sizes = [1, 128], strides = [1, 1]} : vector<1x132xf32> to vector<1x128xf32>
    %68 = arith.addf %66, %67 : vector<1x128xf32>
    %69 = arith.mulf %68, %44 : vector<1x128xf32>
    %70 = arith.mulf %69, %3 : vector<1x128xf32>
    %cst_17 = arith.constant 1.000000e+00 : f32
    %71 = vector.broadcast %cst_17 : f32 to vector<1x128xf32>
    %72 = arith.addf %71, %46 : vector<1x128xf32>
    %cst_18 = arith.constant 9.99999971E-10 : f32
    %73 = vector.broadcast %cst_18 : f32 to vector<1x128xf32>
    %74 = arith.addf %70, %73 : vector<1x128xf32>
    %75 = math.rsqrt %74 : vector<1x128xf32>
    %76 = arith.mulf %72, %75 : vector<1x128xf32>
    %77 = vector.shape_cast %76 : vector<1x128xf32> to vector<1x1x128xf32>
    %78 = vector.broadcast %77 : vector<1x1x128xf32> to vector<1x8x128xf32>
    %79 = arith.mulf %78, %53 : vector<1x8x128xf32>
    %80 = vector.shape_cast %48 : vector<1x128xf32> to vector<1x1x128xf32>
    %81 = vector.broadcast %80 : vector<1x1x128xf32> to vector<1x8x128xf32>
    %82 = arith.addf %79, %81 : vector<1x8x128xf32>
    %c0_19 = arith.constant 0 : index
    %c0_20 = arith.constant 0 : index
    %c0_21 = arith.constant 0 : index
    %83 = vector.load %arg3[%c0_19, %c0_20, %c0_21] : memref<1x8x128xf32, #tpu.memory_space<vmem>>, vector<1x8x128xf32>
    tpu.vector_store %arg3[%c0_19, %c0_20, %c0_21], %82 {strides = array<i32>} : memref<1x8x128xf32, #tpu.memory_space<vmem>>, vector<1x8x128xf32>,
    return
  }
  func.func @transform_0(%arg0: i32) -> (i32, i32, i32) {
    %c0_i32 = arith.constant 0 : i32
    %c0_i32_0 = arith.constant 0 : i32
    %c0_i32_1 = arith.constant 0 : i32
    return %arg0, %c0_i32, %c0_i32_0 : i32, i32, i32
  }
  func.func @transform_1(%arg0: i32) -> (i32, i32, i32) {
    %c0_i32 = arith.constant 0 : i32
    %c0_i32_0 = arith.constant 0 : i32
    %c0_i32_1 = arith.constant 0 : i32
    return %arg0, %c0_i32, %c0_i32_0 : i32, i32, i32
  }
  func.func @transform_2(%arg0: i32) -> (i32, i32, i32) {
    %c0_i32 = arith.constant 0 : i32
    %c0_i32_0 = arith.constant 0 : i32
    %c0_i32_1 = arith.constant 0 : i32
    return %arg0, %c0_i32, %c0_i32_0 : i32, i32, i32
  }
}

</mosaic_0001>

<bundles_post_ra>
// kernel: tpu_custom_call.1
= control target key start
LH: loop header
LB: loop body
LE: loop exit
PB: predicated region body
PF: predicated region fallthrough
CT: control target
= control target key end

     0   :  { %7 = vsyncpa [#allocation3], 0  ;;  %s879_s0 = inlined_call_operand.hbm [shape: f32[2,8,128], index: 0, kind: input, shape index: {}]   ;;  %s880_s1 = inlined_call_operand.vmem [shape: f32[2,3,128], index: 1, kind: input, shape index: {}]   ;;  %s881_s2 = inlined_call_operand.hbm [shape: f32[2,8,128], index: 2, kind: output, shape index: {}]  }
   0x1   :  { %9 = vsyncpa [#allocation3 + $0x1], 0 }
   0x2   :  { %10 = vsyncpa [#allocation4], 0 }
   0x3   :  { %12 = vsyncpa [#allocation4 + $0x1], 0  ;;  %s639_s9 = smov 0   ;;  %s641_s10 = smov 0  }
   0x4   :  { %s643_s11 = smov 0   ;;  %s645_s12 = smov 0  }
   0x5 LB: > { %s660_s13 = sadd.s32 4294967295, %s615_s12   ;;  %s449_s14 = sadd.s32 4294967294, %s615_s12   ;;  %s615_s12 = sphi %s645_s12, %s896_s12   ;;  %s611_s11 = sphi %s643_s11, %s895_s11   ;;  %s607_s10 = sphi %s641_s10, %s894_s10   ;;  %s603_s9 = sphi %s639_s9, %s893_s9  }
   0x6   : > { %s664_s15 = sadd.s32 1, %s615_s12   ;;  %s25_s16 = sadd.s32 1, %s611_s11 }
   0x7   : > { %s22_s17 = ssub.s32 %s615_s12, %s664_s15  ;;  %p32_p0 = scmp.ne.s32.totalorder %s611_s11, %s607_s10 }
   0x8   : > { %p23_p1 = scmp.eq.s32.totalorder %s22_s17, 0  ;;  %p33_p2 = scmp.eq.s32.totalorder %s615_s12, 0 }
   0x9   : > { %p38_p3 = scmp.ne.s32.totalorder %s607_s10, %s603_s9  ;;  %p39_p4 = scmp.eq.s32.totalorder %s660_s13, 0 }
   0xa   : > { %s676_s18 = scalar_select %p23_p1, %s611_s11, %s25_s16  }
   0xb   : > { %p678_p5 = por %p33_p2, %p32_p0  ;;  %p682_p6 = por %p39_p4, %p38_p3 }
   0xc   : > { %p88_p7 = scmp.eq.s32.totalorder %s660_s13, 1  ;;  %p94_p8 = scmp.eq.s32.totalorder %s449_s14, 1 }
   0xd   : > { %p474_p10 = scmp.lt.s32.totalorder %s615_s12, 2  ;;  %s114_s23 = sand.u32 1, %s611_s11  }
   0xe   : > { %p689_p11 = por %p88_p7, %p32_p0  ;;  %p693_p12 = por %p94_p8, %p38_p3 }
   0xf   : > { %s453_s24 = sshll.u32 %s615_s12, 7  ;;  %s452_s25 = sshll.u32 %s114_s23, 3 }
  0x10   : > { %s885_s21 = scalar_select %p689_p11, 1, 0 }
  0x11   : > { %s886_s22 = scalar_select %p693_p12, 1, 0 }
  0x12   : > { %s702_s28 = scalar_lea.hbm %s879_s0, %s453_s24  ;;  %s118_s29 = scalar_lea.vmem [#allocation2], %s452_s25 }
  0x13   : > { %s125_s30 = sshll.u32 %s118_s29, 4  ;;  %p706_p13 = pnand %p474_p10, %p678_p5  ;;  %s710_s30 = int_to_ptr.vmem [resolvable:$true] %s125_s30 }
  0x14   : > { %s115_s4 = scalar_lea.sflag [#allocation3], %s114_s23  ;;  %s519_s5 = scalar_lea.hbm %s702_s28, 128 }
  0x15   : > { %p520_p2 = scmp.ne.s32.totalorder %s702_s28, %s519_s5  ;;  %p521_p3 = pneg %p706_p13 }
  0x16   : > { %s524_s8 = scalar_lea.hbm %s879_s0, 256  ;;  %p525_p5 = scmp.lt.u32.totalorder %s702_s28, %s879_s0 }
  0x17   : > { %p522_p4 = pnand %p521_p3, %p520_p2  ;;  %p526_p8 = scmp.lt.u32.totalorder %s524_s8, %s519_s5 }
  0x18   : > { %p528_p9 = scmp.lt.u32.totalorder %s519_s5, %s702_s28 }
  0x19   : > { %p523_p7 = pneg %p522_p4  ;;  %p527_p10 = por %p526_p8, %p525_p5 }
  0x1b   : > { %p529_p0 = por %p528_p9, %p527_p10 }
  0x1d   : > { %p530_p1 = pnand %p529_p0, %p523_p7 }
  0x1f   : > { %533 = shalt.err (!%p530_p1)
}
  0x20   : > { %s534_s17 = scalar_lea.vmem %s710_s30, 128  ;;  %s617_s19 = smov [#allocation2]  }
  0x21   : > { %p535_p2 = scmp.ne.s32.totalorder %s710_s30, %s534_s17  ;;  %s539_s23 = sshll.u32 %s617_s19, 4  ;;  %s540_s23 = int_to_ptr.vmem [resolvable:$false] %s539_s23 }
  0x22   : > { %s541_s24 = scalar_lea.vmem %s540_s23, 256  ;;  %p542_p11 = scmp.lt.s32.totalorder %s710_s30, %s540_s23 }
  0x23   : > { %p537_p4 = pnand %p535_p2, %p521_p3  ;;  %p543_p5 = scmp.lt.s32.totalorder %s541_s24, %s534_s17 }
  0x25   : > { %p538_p12 = pneg %p537_p4  ;;  %p544_p8 = por %p543_p5, %p542_p11 }
  0x27   : > { %p545_p9 = pnand %p544_p8, %p538_p12 }
  0x29   : > { %548 = shalt.err (!%p545_p9)
}
  0x2a   : > { %469 = dma.hbm_to_vmem [thread:$0]  (!%p706_p13), %s702_s28, 128, %s710_s30, %s115_s4  }
  0x2b   : > { %p888_p0 = scmp.lt.s32.totalorder %s615_s12, 3  ;;  %p889_p1 = scmp.ge.s32.totalorder %s615_s12, 1 }
  0x2d   : > { %p138_p3 = pnand %p889_p1, %p888_p0 }
  0x2e   : > { %s744_s25 = sand.u32 (!%p138_p3), 1, %s607_s10  }
  0x2f   : > { %141 = sbr.rel (%p138_p3) target bundleno = 640 (0x280), region = 28  ;;  %s455_s26 = sshll.u32 (!%p138_p3), %s744_s25, 3 }
  0x30   : > { %s144_s27 = scalar_lea.sflag (!%p138_p3), [#allocation3], %s744_s25  ;;  %s147_s29 = scalar_lea.vmem (!%p138_p3), [#allocation2], %s455_s26 }
  0x36   : > { %594 = dma.done.wait (%p682_p6), %s144_s27, 128  }
  0x37   : > { %596 = vsyncadd (%p682_p6), %s144_s27, 4294967168  ;;  %p172_p11 = scmp.lt.s32.totalorder %s660_s13, 1  ;;  %v761_v1 = vld [vmem:[%s147_s29] sm:$0xff]  ;;  %s618_s6 = smov 2   ;;  %vm182_vm0 = vcmask 15360   ;;  %vm191_vm1 = vcmask 1039360   ;;  %v286_v40 = vlaneseq }
  0x38   : > { %v219_v2 = vrot.slane %v761_v1, 4  ;;  %s619_s20 = smov 127   ;;  %s620_s7 = smov 126   ;;  %vm199_vm2 = vcmask 1031168   ;;  %vm207_vm3 = vcmask 1022976   ;;  %vm215_vm4 = vcmask 1014784  }
  0x39   : > { %s173_s28 = scalar_select %p172_p11, %s660_s13, 1  ;;  %v799_v45 = vshrl.u32 %v286_v40, 7 }
  0x3a   : > { %v220_v3 = vadd.f32 %v219_v2, %v761_v1  ;;  %s621_s8 = smov 125   ;;  %s622_s14 = smov 124  }
  0x3b   : > { %s457_s30 = sshll.u32 %s173_s28, 2  ;;  %v349_v57 = vsub.s32 1, %v799_v45  ;;  %v288_v60 = vsub.s32 0, %v799_v45  ;;  %s459_s16 = sshll.u32 %s660_s13, 7 }
  0x3c   : > { %s175_s5 = scalar_lea.vmem %s880_s1, %s457_s30  ;;  %v221_v4 = vrot.slane %v220_v3, 2  ;;  %s171_s17 = scalar_lea.vmem [#allocation5], %s455_s26 }
  0x3d   : > { %v759_v0 = vld [vmem:[%s175_s5] sm:$0x7]  ;;  %s367_s19 = sshll.u32 %s171_s17, 4  ;;  %s835_s27 = scalar_lea.hbm %s881_s2, %s459_s16  ;;  %s837_s19 = int_to_ptr.vmem [resolvable:$true] %s367_s19 }
  0x3e   : > { %179 = vrot.lane.b32.xlu0 %v759_v0, %s618_s6  ;;  %v222_v5 = vadd.f32 %v221_v4, %v220_v3  ;;  %v278_v50 = vrot.slane %v759_v0, 1  ;;  %v272_v58 = vrot.slane %v759_v0, 2  ;;  %s354_s29 = scalar_lea.sflag [#allocation4], %s744_s25  ;;  %s549_s28 = scalar_lea.vmem %s837_s19, 128 }
  0x3f   : > { %p550_p6 = scmp.ne.s32.totalorder %s837_s19, %s549_s28  ;;  %p890_p12 = scmp.ne.s32.totalorder %s885_s21, 0 }
  0x40   : > { %v223_v6 = vrot.slane %v222_v5, 1  ;;  %s623_s13 = smov [#allocation5]  }
  0x41   : > { %p551_p13 = pnand %p550_p6, %p890_p12  ;;  %s553_s26 = sshll.u32 %s623_s13, 4  ;;  %s554_s26 = int_to_ptr.vmem [resolvable:$false] %s553_s26 }
  0x42   : > { %v224_v7 = vadd.f32 %v223_v6, %v222_v5  ;;  %s555_s30 = scalar_lea.vmem %s554_s26, 256  ;;  %p556_p10 = scmp.lt.s32.totalorder %s837_s19, %s554_s26 }
  0x43   : > { %p552_p7 = pneg %p551_p13  ;;  %p557_p2 = scmp.lt.s32.totalorder %s555_s30, %s549_s28 }
  0x44   : > { %226 = vrot.lane.b32.xlu0 %v224_v7, %s618_s6 }
  0x45   : > { %p558_p4 = por %p557_p2, %p556_p10 }
  0x47   : > { %p559_p5 = pnand %p558_p4, %p552_p7 }
  0xb0   : > { %v180_v8 = vpop.permute.xlu0 %179 }
  0xb1   : > { %v183_v9 = vsel %vm182_vm0, 0.0, %v180_v8  ;;  %v184_v10 = vsel %vm182_vm0, %v180_v8, 0.0 }
  0xb2   : > { %187 = vrot.lane.b32.xlu1 %v183_v9, %s619_s20  ;;  %195 = vrot.lane.b32.xlu0 %v183_v9, %s620_s7 }
  0xb6   : > { %189 = vrot.lane.b32.xlu1 %v184_v10, %s619_s20  ;;  %203 = vrot.lane.b32.xlu0 %v183_v9, %s621_s8  ;;  %v227_v11 = vpop.permute.xlu0 %226 }
  0xb7   : > { %v229_v12 = vsel %vm182_vm0, 0.0, %v227_v11  ;;  %v230_v13 = vsel %vm182_vm0, %v227_v11, 0.0 }
  0xba   : > { %197 = vrot.lane.b32.xlu1 %v184_v10, %s620_s7  ;;  %211 = vrot.lane.b32.xlu0 %v183_v9, %s622_s14 }
  0xbe   : > { %205 = vrot.lane.b32.xlu1 %v184_v10, %s621_s8  ;;  %233 = vrot.lane.b32.xlu0 %v229_v12, %s619_s20 }
  0xc2   : > { %213 = vrot.lane.b32.xlu1 %v184_v10, %s622_s14  ;;  %240 = vrot.lane.b32.xlu0 %v229_v12, %s620_s7 }
  0xc6   : > { %235 = vrot.lane.b32.xlu1 %v230_v13, %s619_s20  ;;  %247 = vrot.lane.b32.xlu0 %v229_v12, %s621_s8 }
  0xca   : > { %242 = vrot.lane.b32.xlu1 %v230_v13, %s620_s7  ;;  %254 = vrot.lane.b32.xlu0 %v229_v12, %s622_s14 }
  0xce   : > { %249 = vrot.lane.b32.xlu1 %v230_v13, %s621_s8 }
  0xd2   : > { %256 = vrot.lane.b32.xlu1 %v230_v13, %s622_s14 }
 0x124   : > { %v188_v14 = vpop.permute.xlu1 %187  ;;  %v196_v15 = vpop.permute.xlu0 %195 }
 0x128   : > { %v190_v16 = vpop.permute.xlu1 %189  ;;  %v204_v17 = vpop.permute.xlu0 %203 }
 0x129   : > { %v192_v20 = vsel %vm191_vm1, %v188_v14, %v190_v16 }
 0x12a   : > { %v194_v22 = vadd.f32 %v192_v20, %v183_v9 }
 0x12c   : > { %v198_v18 = vpop.permute.xlu1 %197  ;;  %v212_v19 = vpop.permute.xlu0 %211 }
 0x12d   : > { %v200_v21 = vsel %vm199_vm2, %v196_v15, %v198_v18 }
 0x12e   : > { %v202_v25 = vadd.f32 %v200_v21, %v194_v22 }
 0x130   : > { %v206_v23 = vpop.permute.xlu1 %205  ;;  %v234_v26 = vpop.permute.xlu0 %233 }
 0x131   : > { %v208_v24 = vsel %vm207_vm3, %v204_v17, %v206_v23 }
 0x132   : > { %v210_v27 = vadd.f32 %v208_v24, %v202_v25 }
 0x134   : > { %v214_v28 = vpop.permute.xlu1 %213  ;;  %v241_v32 = vpop.permute.xlu0 %240 }
 0x135   : > { %v216_v29 = vsel %vm215_vm4, %v212_v19, %v214_v28 }
 0x136   : > { %v792_v30 = vadd.f32 %v216_v29, %v210_v27 }
 0x138   : > { %v261_v31 = vadd.f32 1e-09, %v792_v30  ;;  %v236_v33 = vpop.permute.xlu1 %235  ;;  %v264_v34 = vmul.f32 8.0, %v792_v30  ;;  %v248_v38 = vpop.permute.xlu0 %247 }
 0x139   : > { %v237_v37 = vsel %vm191_vm1, %v234_v26, %v236_v33 }
 0x13a   : > { %513 = vrcp.f32 %v261_v31  ;;  %v265_v35 = vadd.f32 1e-09, %v264_v34  ;;  %v239_v41 = vadd.f32 %v237_v37, %v229_v12 }
 0x13c   : > { %v243_v36 = vpop.permute.xlu1 %242  ;;  %515 = vrcp.f32 %v265_v35  ;;  %v255_v47 = vpop.permute.xlu0 %254 }
 0x13d   : > { %v244_v39 = vsel %vm199_vm2, %v241_v32, %v243_v36 }
 0x13e   : > { %v246_v44 = vadd.f32 %v244_v39, %v239_v41 }
 0x140   : > { %v250_v42 = vpop.permute.xlu1 %249 }
 0x141   : > { %v251_v43 = vsel %vm207_vm3, %v248_v38, %v250_v42 }
 0x142   : > { %v253_v48 = vadd.f32 %v251_v43, %v246_v44 }
 0x144   : > { %v801_v46 = vpop.eup %513  ;;  %v257_v49 = vpop.permute.xlu1 %256 }
 0x145   : > { %v275_v51 = vrot.slane %v801_v46, 1  ;;  %v258_v52 = vsel %vm215_vm4, %v255_v47, %v257_v49  ;;  %v269_v33 = vrot.slane %v801_v46, 2 }
 0x146   : > { %v516_v53 = vpop.eup %515  ;;  %v260_v54 = vadd.f32 %v258_v52, %v253_v48 }
 0x147   : > { %v277_v55 = vmul.f32 %v275_v51, %v792_v30  ;;  %v282_v56 = vrot.slane %v516_v53, 2  ;;  %v271_v35 = vmul.f32 %v269_v33, %v792_v30 }
 0x149   : > { %v280_v59 = vmul.f32 %v278_v50, %v277_v55  ;;  %v284_v61 = vmul.f32 %v282_v56, %v260_v54  ;;  %v274_v36 = vmul.f32 %v272_v58, %v271_v35 }
 0x14b   : > { %v285_v62 = vmul.f32 %v284_v61, %v272_v58  ;;  %v350_v63 = vrot.slane %v280_v59, %v349_v57  ;;  %v338_v37 = vadd.f32 1.0, %v274_v36 }
 0x14d   : > { %v289_v2 = vrot.slane %v285_v62, %v288_v60 }
 0x14f   : > { %v290_v3 = vsub.f32 %v761_v1, %v289_v2 }
 0x151   : > { %v291_v4 = vmul.f32 %v290_v3, %v290_v3 }
 0x153   : > { %v292_v5 = vrot.slane %v291_v4, 4 }
 0x155   : > { %v293_v6 = vadd.f32 %v292_v5, %v291_v4 }
 0x157   : > { %v294_v7 = vrot.slane %v293_v6, 2 }
 0x159   : > { %v295_v8 = vadd.f32 %v294_v7, %v293_v6 }
 0x15b   : > { %v296_v9 = vrot.slane %v295_v8, 1 }
 0x15d   : > { %v297_v10 = vadd.f32 %v296_v9, %v295_v8 }
 0x15f   : > { %v298_v11 = vmul.f32 %v297_v10, %v759_v0 }
 0x161   : > { %v300_v12 = vrot.slane %v298_v11, 2 }
 0x163   : > { %301 = vrot.lane.b32.xlu0 %v300_v12, %s618_s6 }
 0x1d5   : > { %v302_v13 = vpop.permute.xlu0 %301 }
 0x1d6   : > { %v304_v14 = vsel %vm182_vm0, 0.0, %v302_v13  ;;  %v305_v15 = vsel %vm182_vm0, %v302_v13, 0.0 }
 0x1d7   : > { %310 = vrot.lane.b32.xlu0 %v305_v15, %s619_s20  ;;  %308 = vrot.lane.b32.xlu1 %v304_v14, %s619_s20 }
 0x1db   : > { %317 = vrot.lane.b32.xlu0 %v305_v15, %s620_s7  ;;  %315 = vrot.lane.b32.xlu1 %v304_v14, %s620_s7 }
 0x1df   : > { %324 = vrot.lane.b32.xlu0 %v305_v15, %s621_s8  ;;  %322 = vrot.lane.b32.xlu1 %v304_v14, %s621_s8 }
 0x1e3   : > { %331 = vrot.lane.b32.xlu0 %v305_v15, %s622_s14  ;;  %329 = vrot.lane.b32.xlu1 %v304_v14, %s622_s14 }
 0x249   : > { %v311_v0 = vpop.permute.xlu0 %310  ;;  %v309_v1 = vpop.permute.xlu1 %308 }
 0x24a   : > { %v312_v18 = vsel %vm191_vm1, %v309_v1, %v311_v0 }
 0x24b   : > { %v314_v20 = vadd.f32 %v312_v18, %v304_v14 }
 0x24d   : > { %v318_v16 = vpop.permute.xlu0 %317  ;;  %v316_v17 = vpop.permute.xlu1 %315 }
 0x24e   : > { %v319_v19 = vsel %vm199_vm2, %v316_v17, %v318_v16 }
 0x24f   : > { %v321_v24 = vadd.f32 %v319_v19, %v314_v20 }
 0x251   : > { %v325_v21 = vpop.permute.xlu0 %324  ;;  %v323_v22 = vpop.permute.xlu1 %322 }
 0x252   : > { %v326_v23 = vsel %vm207_vm3, %v323_v22, %v325_v21 }
 0x253   : > { %v328_v25 = vadd.f32 %v326_v23, %v321_v24 }
 0x255   : > { %v332_v26 = vpop.permute.xlu0 %331  ;;  %v330_v27 = vpop.permute.xlu1 %329 }
 0x256   : > { %v333_v28 = vsel %vm215_vm4, %v330_v27, %v332_v26 }
 0x257   : > { %v335_v29 = vadd.f32 %v333_v28, %v328_v25 }
 0x259   : > { %v336_v31 = vmul.f32 %v335_v29, %v282_v56 }
 0x25b   : > { %v337_v32 = vmul.f32 %v336_v31, %v272_v58 }
 0x25d   : > { %v339_v34 = vadd.f32 1e-09, %v337_v32 }
 0x25f   : > { %517 = vrsqrt.f32 %v339_v34 }
 0x269   : > { %v518_v38 = vpop.eup %517 }
 0x26a   : > { %v341_v39 = vmul.f32 %v518_v38, %v338_v37 }
 0x26c   : > { %v345_v40 = vrot.slane %v341_v39, %v288_v60 }
 0x26e   : > { %v346_v41 = vmul.f32 %v345_v40, %v290_v3 }
 0x270   : > { %v351_v42 = vadd.f32 %v350_v63, %v346_v41 }
 0x272   : > { %352 = vst [vmem:[%s171_s17] sm:$0xff] %v351_v42 }
 0x273   : > { %562 = shalt.err (!%p559_p5)
}
 0x274   : > { %s563_s25 = scalar_lea.hbm %s835_s27, 128  ;;  %s567_s5 = scalar_lea.hbm %s881_s2, 256 }
 0x275   : > { %p564_p8 = scmp.ne.s32.totalorder %s835_s27, %s563_s25  ;;  %p568_p1 = scmp.lt.u32.totalorder %s835_s27, %s881_s2 }
 0x276   : > { %p569_p3 = scmp.lt.u32.totalorder %s567_s5, %s563_s25  ;;  %p571_p6 = scmp.lt.u32.totalorder %s563_s25, %s835_s27 }
 0x277   : > { %p565_p9 = pnand %p564_p8, %p890_p12 }
 0x278   : > { %p570_p11 = por %p569_p3, %p568_p1 }
 0x279   : > { %p566_p0 = pneg %p565_p9 }
 0x27a   : > { %p572_p13 = por %p571_p6, %p570_p11 }
 0x27c   : > { %p573_p7 = pnand %p572_p13, %p566_p0 }
 0x27e   : > { %576 = shalt.err (!%p573_p7)
}
 0x27f   : > { %464 = dma.vmem_to_hbm [thread:$0]  (%p890_p12), %s837_s19, 128, %s835_s27, %s354_s29  }
 0x280 PF: > { %s379_s7 = sand.u32 1, %s603_s9   ;;  %p891_p10 = scmp.ne.s32.totalorder %s886_s22, 0 }
 0x281   : > { %p892_p2 = scmp.ge.s32.totalorder %s615_s12, 2  ;;  %s380_s8 = scalar_lea.sflag [#allocation4], %s379_s7 }
 0x283   : > { %p471_p4 = pnand %p892_p2, %p891_p10 }
 0x285   : > { %598 = dma.done.wait (!%p471_p4), %s380_s8, 128  }
 0x286   : > { %600 = vsyncadd (!%p471_p4), %s380_s8, 4294967168  ;;  %p15_p5 = scmp.ge.s32.totalorder %s664_s15, 4   ;;  %s893_s9 = smov %s607_s10 }
 0x287   : > { %s894_s10 = smov %s611_s11  ;;  %s895_s11 = smov %s676_s18 }
 0x288   : > { %s896_s12 = smov %s664_s15  ;;  %17 = sbr.rel (!%p15_p5) target bundleno = 5 (0x5), region = 76 }
 0x28f   :  { %385 = vsyncpa [#allocation3], 1 }
 0x290   :  { %387 = vsyncpa [#allocation3 + $0x1], 1 }
 0x291   :  { %388 = vsyncpa [#allocation4], 1 }
 0x292   :  { %390 = vsyncpa [#allocation4 + $0x1], 1 }

</bundles_post_ra>
